<compile_context>
chip_gen: v7x
topology: tpu7x:2x2x1
jax: 0.10.0
libtpu: 0.0.40
codegen_flags: <defaults>
</compile_context>

<pallas_src>
import jax
import jax.numpy as jnp
from jax.experimental import pallas as pl
from jax.experimental.pallas import tpu as pltpu

HIDDEN_LAYERS_DIM = [32, 16, 8]   # matches the module default
BN_EPS = 1e-5


def _round_up(n: int, m: int) -> int:
    return ((n + m - 1) // m) * m


def mlp_kernel(*refs):
    """refs = xT, [W (out,in), c (out,1)] * n_hidden, w_out (in,1), b_out (1,1), outT."""
    n_hidden = len(HIDDEN_LAYERS_DIM)
    x_ref = refs[0]
    out_ref = refs[-1]

    # Single deliberate cast point: bf16 (HBM stream) -> f32 (compute).
    h = x_ref[...].astype(jnp.float32)            # (d_in, TB), batch on lanes

    idx = 1
    for _ in range(n_hidden):
        w_ref, c_ref = refs[idx], refs[idx + 1]
        idx += 2
        # Linear with BatchNorm + bias pre-folded into (W, c); then ReLU.
        h = jnp.dot(w_ref[...], h, preferred_element_type=jnp.float32) + c_ref[...]
        h = jnp.maximum(h, 0.0)
        # Dropout(p=0.2): identity in inference mode.
        # TODO(synk): training-mode dropout / batch-stat BatchNorm not reproduced.

    # Final Linear(8 -> 1): degenerate MXU shape -> VPU multiply + sublane reduce.
    w_out_ref, b_out_ref = refs[idx], refs[idx + 1]
    y = jnp.sum(h * w_out_ref[...], axis=0, keepdims=True) + b_out_ref[...]
    out_ref[...] = y.astype(out_ref.dtype)        # (1, TB), lane-dense store


def init_params(key, input_dim):
    """Deterministic init mirroring nn.Linear default (U[-1/sqrt(fan_in), ...])."""
    params = {"hidden": []}
    d_in = input_dim
    for d_out in HIDDEN_LAYERS_DIM:
        key, kw, kb = jax.random.split(key, 3)
        bound = 1.0 / float(jnp.sqrt(jnp.float32(d_in)))
        w = jax.random.uniform(kw, (d_in, d_out), jnp.float32, -bound, bound)
        b = jax.random.uniform(kb, (1, d_out), jnp.float32, -bound, bound)
        # BatchNorm1d params / running stats at their PyTorch init values.
        gamma = jnp.ones((1, d_out), jnp.float32)
        beta = jnp.zeros((1, d_out), jnp.float32)
        running_mean = jnp.zeros((1, d_out), jnp.float32)
        running_var = jnp.ones((1, d_out), jnp.float32)
        scale = gamma / jnp.sqrt(running_var + BN_EPS)
        shift = beta - running_mean * scale
        params["hidden"].append({"w": w, "b": b, "scale": scale, "shift": shift})
        d_in = d_out
    key, kw, kb = jax.random.split(key, 3)
    bound = 1.0 / float(jnp.sqrt(jnp.float32(d_in)))
    params["out_w"] = jax.random.uniform(kw, (d_in, 1), jnp.float32, -bound, bound)
    params["out_b"] = jax.random.uniform(kb, (1, 1), jnp.float32, -bound, bound)
    return params


def mlp_forward(x, params, *, block_batch=1024):
    """Fused inference forward. x: (B, D_in) float -> (B, 1)."""
    batch, d_in = x.shape

    # Batch tile on the 128-lane axis; pad batch up to a multiple of TB.
    tb = _round_up(min(block_batch, _round_up(max(batch, 1), 128)), 128)
    b_pad = _round_up(batch, tb)
    grid = (b_pad // tb,)

    def const_spec(shape):
        # Weights/biases: full-array block, resident across all grid steps.
        return pl.BlockSpec(shape, lambda i: (0, 0))

    flat, specs = [], []

    # x transposed to (D_in, B_pad), streamed as bf16 (halves HBM bytes).
    x_t = jnp.pad(x.T.astype(jnp.bfloat16), ((0, 0), (0, b_pad - batch)))
    flat.append(x_t)
    specs.append(pl.BlockSpec((d_in, tb), lambda i: (0, i)))

    # Fold BatchNorm (running stats) + Linear bias into weights on host;
    # transpose to (out_dim, in_dim) for the lane-dense layout.
    for p in params["hidden"]:
        w = (p["w"] * p["scale"]).T.astype(jnp.float32)                    # (out, in)
        c = (p["b"] * p["scale"] + p["shift"]).reshape(-1, 1).astype(jnp.float32)
        flat += [w, c]
        specs += [const_spec(w.shape), const_spec(c.shape)]

    w_out = params["out_w"].astype(jnp.float32)                            # (d_last, 1)
    b_out = params["out_b"].reshape(1, 1).astype(jnp.float32)
    flat += [w_out, b_out]
    specs += [const_spec(w_out.shape), const_spec(b_out.shape)]

    out_t = pl.pallas_call(
        mlp_kernel,
        out_shape=jax.ShapeDtypeStruct((1, b_pad), jnp.float32),
        grid=grid,
        in_specs=specs,
        out_specs=pl.BlockSpec((1, tb), lambda i: (0, i)),
        compiler_params=pltpu.CompilerParams(
            dimension_semantics=("parallel",)),
    )(*flat)

    return out_t[0, :batch].reshape(batch, 1).astype(x.dtype)


def mlp_reference(x, params):
    h = x.astype(jnp.float32)
    for p in params["hidden"]:
        h = h @ p["w"] + p["b"]
        h = h * p["scale"] + p["shift"]
        h = jnp.maximum(h, 0.0)
    return (h @ params["out_w"] + params["out_b"]).astype(x.dtype)


if __name__ == "__main__":
    key = jax.random.PRNGKey(0)
    kx, kp = jax.random.split(key)

    batch, embed_dim = 8, 32
    x = jax.random.normal(kx, (batch, embed_dim), jnp.float32)
    params = init_params(kp, embed_dim)

    out = mlp_forward(x, params)
    out = jax.block_until_ready(out)

    ref = mlp_reference(x, params)
    assert out.shape == (batch, 1)
    # Looser tolerance than before: x is streamed as bf16 (per perf review),
    # which introduces ~1e-3..1e-2 level differences vs the pure-f32 reference.
    assert jnp.allclose(out, ref, atol=2e-2, rtol=2e-2)

    print("KERNEL_OK")
</pallas_src>

<mosaic_0001>
module attributes {stable_mosaic.version = 11 : i64} {
  func.func @mlp_kernel(%arg0: i32, %arg1: memref<32x128xbf16, #tpu.memory_space<vmem>>, %arg2: memref<32x32xf32, #tpu.memory_space<vmem>>, %arg3: memref<32x1xf32, #tpu.memory_space<vmem>>, %arg4: memref<16x32xf32, #tpu.memory_space<vmem>>, %arg5: memref<16x1xf32, #tpu.memory_space<vmem>>, %arg6: memref<8x16xf32, #tpu.memory_space<vmem>>, %arg7: memref<8x1xf32, #tpu.memory_space<vmem>>, %arg8: memref<8x1xf32, #tpu.memory_space<vmem>>, %arg9: memref<1x1xf32, #tpu.memory_space<vmem>>, %arg10: memref<1x128xf32, #tpu.memory_space<vmem>>) attributes {dimension_semantics = [#tpu.dimension_semantics<parallel>], iteration_bounds = array<i64: 1>, scalar_prefetch = 0 : i64, scratch_operands = 0 : i64, tpu.core_type = #tpu.core_type<tc>, window_params = [{transform_indices = @transform_0, window_bounds = array<i64: 32, 128>}, {pipeline_mode = #tpu.pipeline_mode<synchronous>, transform_indices = @transform_1, window_bounds = array<i64: 32, 32>}, {pipeline_mode = #tpu.pipeline_mode<synchronous>, transform_indices = @transform_2, window_bounds = array<i64: 32, 1>}, {pipeline_mode = #tpu.pipeline_mode<synchronous>, transform_indices = @transform_3, window_bounds = array<i64: 16, 32>}, {pipeline_mode = #tpu.pipeline_mode<synchronous>, transform_indices = @transform_4, window_bounds = array<i64: 16, 1>}, {pipeline_mode = #tpu.pipeline_mode<synchronous>, transform_indices = @transform_5, window_bounds = array<i64: 8, 16>}, {pipeline_mode = #tpu.pipeline_mode<synchronous>, transform_indices = @transform_6, window_bounds = array<i64: 8, 1>}, {pipeline_mode = #tpu.pipeline_mode<synchronous>, transform_indices = @transform_7, window_bounds = array<i64: 8, 1>}, {pipeline_mode = #tpu.pipeline_mode<synchronous>, transform_indices = @transform_8, window_bounds = array<i64: 1, 1>}, {transform_indices = @transform_9, window_bounds = array<i64: 1, 128>}]} {
    %c0 = arith.constant 0 : index
    %c0_0 = arith.constant 0 : index
    %0 = vector.load %arg1[%c0, %c0_0] : memref<32x128xbf16, #tpu.memory_space<vmem>>, vector<32x128xbf16>
    %1 = arith.extf %0 : vector<32x128xbf16> to vector<32x128xf32>
    %c0_1 = arith.constant 0 : index
    %c0_2 = arith.constant 0 : index
    %2 = vector.load %arg2[%c0_1, %c0_2] : memref<32x32xf32, #tpu.memory_space<vmem>>, vector<32x32xf32>
    %cst = arith.constant dense<0.000000e+00> : vector<32x128xf32>
    %3 = tpu.matmul %2, %1, %cst {dimension_numbers = #tpu.dot_dimension_numbers<[1], [0], [0], [1], [0, 0, 1, 1], [], []>} : vector<32x32xf32>, vector<32x128xf32>, vector<32x128xf32> -> vector<32x128xf32>
    %c0_3 = arith.constant 0 : index
    %c0_4 = arith.constant 0 : index
    %4 = vector.load %arg3[%c0_3, %c0_4] : memref<32x1xf32, #tpu.memory_space<vmem>>, vector<32x1xf32>
    %5 = vector.broadcast %4 : vector<32x1xf32> to vector<32x128xf32>
    %6 = arith.addf %3, %5 : vector<32x128xf32>
    %cst_5 = arith.constant 0.000000e+00 : f32
    %7 = vector.broadcast %cst_5 : f32 to vector<32x128xf32>
    %8 = arith.maximumf %6, %7 : vector<32x128xf32>
    %c0_6 = arith.constant 0 : index
    %c0_7 = arith.constant 0 : index
    %9 = vector.load %arg4[%c0_6, %c0_7] : memref<16x32xf32, #tpu.memory_space<vmem>>, vector<16x32xf32>
    %cst_8 = arith.constant dense<0.000000e+00> : vector<16x128xf32>
    %10 = tpu.matmul %9, %8, %cst_8 {dimension_numbers = #tpu.dot_dimension_numbers<[1], [0], [0], [1], [0, 0, 1, 1], [], []>} : vector<16x32xf32>, vector<32x128xf32>, vector<16x128xf32> -> vector<16x128xf32>
    %c0_9 = arith.constant 0 : index
    %c0_10 = arith.constant 0 : index
    %11 = vector.load %arg5[%c0_9, %c0_10] : memref<16x1xf32, #tpu.memory_space<vmem>>, vector<16x1xf32>
    %12 = vector.broadcast %11 : vector<16x1xf32> to vector<16x128xf32>
    %13 = arith.addf %10, %12 : vector<16x128xf32>
    %cst_11 = arith.constant 0.000000e+00 : f32
    %14 = vector.broadcast %cst_11 : f32 to vector<16x128xf32>
    %15 = arith.maximumf %13, %14 : vector<16x128xf32>
    %c0_12 = arith.constant 0 : index
    %c0_13 = arith.constant 0 : index
    %16 = vector.load %arg6[%c0_12, %c0_13] : memref<8x16xf32, #tpu.memory_space<vmem>>, vector<8x16xf32>
    %cst_14 = arith.constant dense<0.000000e+00> : vector<8x128xf32>
    %17 = tpu.matmul %16, %15, %cst_14 {dimension_numbers = #tpu.dot_dimension_numbers<[1], [0], [0], [1], [0, 0, 1, 1], [], []>} : vector<8x16xf32>, vector<16x128xf32>, vector<8x128xf32> -> vector<8x128xf32>
    %c0_15 = arith.constant 0 : index
    %c0_16 = arith.constant 0 : index
    %18 = vector.load %arg7[%c0_15, %c0_16] : memref<8x1xf32, #tpu.memory_space<vmem>>, vector<8x1xf32>
    %19 = vector.broadcast %18 : vector<8x1xf32> to vector<8x128xf32>
    %20 = arith.addf %17, %19 : vector<8x128xf32>
    %cst_17 = arith.constant 0.000000e+00 : f32
    %21 = vector.broadcast %cst_17 : f32 to vector<8x128xf32>
    %22 = arith.maximumf %20, %21 : vector<8x128xf32>
    %c0_18 = arith.constant 0 : index
    %c0_19 = arith.constant 0 : index
    %23 = vector.load %arg8[%c0_18, %c0_19] : memref<8x1xf32, #tpu.memory_space<vmem>>, vector<8x1xf32>
    %24 = vector.broadcast %23 : vector<8x1xf32> to vector<8x128xf32>
    %25 = arith.mulf %22, %24 : vector<8x128xf32>
    %cst_20 = arith.constant dense<0.000000e+00> : vector<128xf32>
    %26 = vector.multi_reduction <add>, %25, %cst_20 [0] : vector<8x128xf32> to vector<128xf32>
    %27 = vector.shape_cast %26 : vector<128xf32> to vector<1x128xf32>
    %c0_21 = arith.constant 0 : index
    %c0_22 = arith.constant 0 : index
    %28 = vector.load %arg9[%c0_21, %c0_22] : memref<1x1xf32, #tpu.memory_space<vmem>>, vector<1x1xf32>
    %29 = vector.broadcast %28 : vector<1x1xf32> to vector<1x128xf32>
    %30 = arith.addf %27, %29 : vector<1x128xf32>
    %c0_23 = arith.constant 0 : index
    %c0_24 = arith.constant 0 : index
    %31 = vector.load %arg10[%c0_23, %c0_24] : memref<1x128xf32, #tpu.memory_space<vmem>>, vector<1x128xf32>
    tpu.vector_store %arg10[%c0_23, %c0_24], %30 {strides = array<i32>} : memref<1x128xf32, #tpu.memory_space<vmem>>, vector<1x128xf32>,
    return
  }
  func.func @transform_0(%arg0: i32) -> (i32, i32) {
    %c0_i32 = arith.constant 0 : i32
    %c0_i32_0 = arith.constant 0 : i32
    return %c0_i32, %arg0 : i32, i32
  }
  func.func @transform_1(%arg0: i32) -> (i32, i32) {
    %c0_i32 = arith.constant 0 : i32
    %c0_i32_0 = arith.constant 0 : i32
    %c0_i32_1 = arith.constant 0 : i32
    return %c0_i32, %c0_i32_0 : i32, i32
  }
  func.func @transform_2(%arg0: i32) -> (i32, i32) {
    %c0_i32 = arith.constant 0 : i32
    %c0_i32_0 = arith.constant 0 : i32
    %c0_i32_1 = arith.constant 0 : i32
    return %c0_i32, %c0_i32_0 : i32, i32
  }
  func.func @transform_3(%arg0: i32) -> (i32, i32) {
    %c0_i32 = arith.constant 0 : i32
    %c0_i32_0 = arith.constant 0 : i32
    %c0_i32_1 = arith.constant 0 : i32
    return %c0_i32, %c0_i32_0 : i32, i32
  }
  func.func @transform_4(%arg0: i32) -> (i32, i32) {
    %c0_i32 = arith.constant 0 : i32
    %c0_i32_0 = arith.constant 0 : i32
    %c0_i32_1 = arith.constant 0 : i32
    return %c0_i32, %c0_i32_0 : i32, i32
  }
  func.func @transform_5(%arg0: i32) -> (i32, i32) {
    %c0_i32 = arith.constant 0 : i32
    %c0_i32_0 = arith.constant 0 : i32
    %c0_i32_1 = arith.constant 0 : i32
    return %c0_i32, %c0_i32_0 : i32, i32
  }
  func.func @transform_6(%arg0: i32) -> (i32, i32) {
    %c0_i32 = arith.constant 0 : i32
    %c0_i32_0 = arith.constant 0 : i32
    %c0_i32_1 = arith.constant 0 : i32
    return %c0_i32, %c0_i32_0 : i32, i32
  }
  func.func @transform_7(%arg0: i32) -> (i32, i32) {
    %c0_i32 = arith.constant 0 : i32
    %c0_i32_0 = arith.constant 0 : i32
    %c0_i32_1 = arith.constant 0 : i32
    return %c0_i32, %c0_i32_0 : i32, i32
  }
  func.func @transform_8(%arg0: i32) -> (i32, i32) {
    %c0_i32 = arith.constant 0 : i32
    %c0_i32_0 = arith.constant 0 : i32
    %c0_i32_1 = arith.constant 0 : i32
    return %c0_i32, %c0_i32_0 : i32, i32
  }
  func.func @transform_9(%arg0: i32) -> (i32, i32) {
    %c0_i32 = arith.constant 0 : i32
    %c0_i32_0 = arith.constant 0 : i32
    return %c0_i32, %arg0 : i32, i32
  }
}

</mosaic_0001>

<bundles_post_ra>
// kernel: tpu_custom_call.1
= control target key start
LH: loop header
LB: loop body
LE: loop exit
PB: predicated region body
PF: predicated region fallthrough
CT: control target
= control target key end

     0   :  { %s633_s0 = inlined_call_operand.vmem [shape: bf16[32,128], index: 0, kind: input, shape index: {}]   ;;  %s634_s1 = inlined_call_operand.vmem [shape: f32[32,32], index: 1, kind: input, shape index: {}]   ;;  %s635_s2 = inlined_call_operand.vmem [shape: f32[32,1], index: 2, kind: input, shape index: {}]   ;;  %s636_s3 = inlined_call_operand.vmem [shape: f32[16,32], index: 3, kind: input, shape index: {}]   ;;  %s637_s4 = inlined_call_operand.vmem [shape: f32[16,1], index: 4, kind: input, shape index: {}]   ;;  %s638_s5 = inlined_call_operand.vmem [shape: f32[8,16], index: 5, kind: input, shape index: {}]   ;;  %s639_s6 = inlined_call_operand.vmem [shape: f32[8,1], index: 6, kind: input, shape index: {}]   ;;  %s640_s7 = inlined_call_operand.vmem [shape: f32[8,1], index: 7, kind: input, shape index: {}]   ;;  %s641_s8 = inlined_call_operand.<no memory space> [shape: f32[1,1], index: 8, kind: input, shape index: {}]   ;;  %s642_s9 = inlined_call_operand.hbm [shape: f32[1,128], index: 9, kind: output, shape index: {}]  }
   0x1   :  { %v14_v0 = vstv %s641_s8 }
   0x2   :  { %15 = vst [vmem:[#allocation2] sm:$0x1] %v14_v0 }
   0x3   :  { %v399_v1 = vld [vmem:[%s633_s0] sm:$0xff]   ;;  %v406_v2 = vld [vmem:[%s633_s0 + $0x8] sm:$0xff]   ;;  %vm71_vm0 = vcmask 261120   ;;  %v506_v4 = vmov 0   ;;  %v49_v6 = vld [vmem:[%s635_s2 + $0x10] sm:$0xff] }
   0x4   :  { %v43_v3 = vld [vmem:[%s634_s1] sm:$0xff]  ;;  %457 = vmatprep.subr.bf16.mxu0 %v399_v1  ;;  %480 = vset.pattern.permute.xlu0 %v506_v4  ;;  %v48_v7 = vld [vmem:[%s635_s2 + $0x8] sm:$0xff] }
   0x5   :  { %432 = vmatprep.mubr.msk.f32.mxu0 %vm71_vm0, %v43_v3  ;;  %459 = vmatpush3.bf16.msra.mxu0 %v399_v1  ;;  %v47_v5 = vld [vmem:[%s635_s2] sm:$0xff] }
   0x6   :  { %461 = vmatprep.subr.bf16.mxu0 %v406_v2  ;;  %53 = vperm.xlu0 %480, %v47_v5  }
   0x7   :  { %481 = vset.pattern.permute.xlu1 %v506_v4 }
   0x8   :  { %63 = vperm.xlu1 %481, %v49_v6  }
   0x9   :  { %16 = vsyncpa [#allocation4], 0  ;;  %463 = vmatpush3.bf16.msra.mxu0 %v406_v2  ;;  %v44_v8 = vld [vmem:[%s634_s1 + $0x8] sm:$0xff]  ;;  %v50_v9 = vld [vmem:[%s635_s2 + $0x18] sm:$0xff]  ;;  %v507_v37 = vmov 0.0|0.0   ;;  %vm508_vm1 = vmmov 0   ;;  %v371_v55 = vlaneseq }
   0xa   :  { %v45_v10 = vld [vmem:[%s634_s1 + $0x10] sm:$0xff]  ;;  %58 = vperm.xlu0 %480, %v48_v7   ;;  %v175_v11 = vld [vmem:[%s637_s4] sm:$0xff]  ;;  %v46_v12 = vld [vmem:[%s634_s1 + $0x18] sm:$0xff]  ;;  %v509_v38 = vmov 0.0   ;;  %vm277_vm2 = vcmask 130048  }
   0xb   :  { %v176_v13 = vld [vmem:[%s637_s4 + $0x8] sm:$0xff]  ;;  %v271_v14 = vld [vmem:[%s639_s6] sm:$0xff]  ;;  %v372_v58 = vshrl.u32 %v371_v55, 7 }
   0xc   :  { %433 = vmatmul.mubr.msk.f32.vlgmr.msra.gmra.mrb[0].mxu0 %vm71_vm0, %v44_v8  ;;  %68 = vperm.xlu1 %481, %v50_v9   ;;  %v352_v15 = vld [vmem:[%s640_s7] sm:$0xff]  ;;  %v174_v36 = vld [vmem:[%s636_s3 + $0x8] sm:$0xff] }
   0xd   :  { %435 = vmatprep.mubr.msk.f32.mxu0 %vm71_vm0, %v45_v10  ;;  %v365_v16 = vld [vmem:[#allocation2] sm:$0x1]  ;;  %v373_v61 = vsub.s32 0, %v372_v58 }
   0xe   :  { %179 = vperm.xlu0 %480, %v175_v11   ;;  %v173_v17 = vld [vmem:[%s636_s3] sm:$0xff]  ;;  %s510_s3 = smov [#allocation3]  }
   0xf   :  { %446 = vmatprep.mubr.msk.f32.mxu1 %vm71_vm0, %v173_v17  ;;  %v270_v48 = vld [vmem:[%s638_s5] sm:$0xff]  ;;  %s383_s5 = sshll.u32 %s510_s3, 4  ;;  %s384_s5 = int_to_ptr.vmem [resolvable:$true] %s383_s5 }
  0x10   :  { %436 = vmatmul.mubr.msk.f32.gmra.mrb[2].mxu0 %vm71_vm0, %v46_v12  ;;  %184 = vperm.xlu1 %481, %v176_v13   ;;  %s482_s8 = scalar_lea.vmem %s384_s5, 16  ;;  %s486_s17 = scalar_lea.vmem %s384_s5, 32 }
  0x11   :  { %p483_p0 = scmp.ne.s32.totalorder %s384_s5, %s482_s8  ;;  %p487_p1 = scmp.lt.s32.totalorder %s384_s5, %s384_s5 }
  0x12   :  { %274 = vperm.xlu0 %480, %v271_v14   ;;  %p488_p2 = scmp.lt.s32.totalorder %s486_s17, %s482_s8 }
  0x14   :  { %355 = vperm.xlu1 %481, %v352_v15   ;;  %p489_p3 = por %p488_p2, %p487_p1 }
  0x16   :  { %368 = vperm.xlu0 %480, %v365_v16   ;;  %p490_p4 = pnand %p489_p3, %p483_p0 }
  0x85   :  { %v54_v18 = vpop.permute.xlu0 %53 }
  0x87   :  { %v64_v19 = vpop.permute.xlu1 %63 }
  0x89   :  { %v59_v20 = vpop.permute.xlu0 %58 }
  0x8b   :  { %v69_v26 = vpop.permute.xlu1 %68 }
  0x8d   :  { %v180_v41 = vpop.permute.xlu0 %179 }
  0x8f   :  { %v185_v39 = vpop.permute.xlu1 %184 }
  0x91   :  { %v275_v49 = vpop.permute.xlu0 %274 }
  0x93   :  { %v356_v54 = vpop.permute.xlu1 %355 }
  0x95   :  { %v369_v63 = vpop.permute.xlu0 %368 }
  0x96   :  { %v374_v1 = vrot.slane %v369_v63, %v373_v61 }
  0xdf   :  { %v434_v21 = vpop.f32.mrb[0].mxu0 }
  0xe0   :  { %v156_v22 = vadd.f32 %v434_v21, %v59_v20  ;;  %v150_v23 = vpop.f32.mrb[1].mxu0 }
  0xe1   :  { %v151_v24 = vadd.f32 %v150_v23, %v54_v18 }
  0xe2   :  { %v170_v25 = vmax.f32 %v156_v22, 0.0 }
  0xe3   :  { %v169_v27 = vmax.f32 %v151_v24, 0.0  ;;  %v437_v28 = vpop.f32.mrb[2].mxu0 }
  0xe4   :  { %v166_v29 = vadd.f32 %v437_v28, %v69_v26  ;;  %v160_v30 = vpop.f32.mrb[3].mxu0 }
  0xe5   :  { %v161_v31 = vadd.f32 %v160_v30, %v64_v19  ;;  %v464_v32 = vpack.c.bf16 %v170_v25, %v169_v27 }
  0xe6   :  { %v172_v33 = vmax.f32 %v166_v29, 0.0 }
  0xe7   :  { %v171_v34 = vmax.f32 %v161_v31, 0.0  ;;  %465 = vmatprep.subr.bf16.mxu1 %v464_v32 }
  0xe8   :  { %467 = vmatpush3.bf16.msra.mxu1 %v464_v32 }
  0xe9   :  { %v468_v35 = vpack.c.bf16 %v172_v33, %v171_v34 }
  0xeb   :  { %469 = vmatprep.subr.bf16.mxu1 %v468_v35 }
  0xec   :  { %471 = vmatpush3.bf16.msra.mxu1 %v468_v35 }
  0xed   :  { %472 = vmatprep.subr.bf16.mxu1 %v507_v37 }
  0xef   :  { %447 = vmatmul.mubr.msk.f32.vlgmr.msra.gmra.mrb[0].mxu1 %vm71_vm0, %v174_v36 }
  0xf0   :  { %453 = vmatprep.mubr.msk.f32.mxu1 %vm508_vm1, %v509_v38 }
 0x1c2   :  { %v448_v40 = vpop.f32.mrb[0].mxu1 }
 0x1c3   :  { %v265_v42 = vadd.f32 %v448_v40, %v185_v39  ;;  %v259_v43 = vpop.f32.mrb[1].mxu1 }
 0x1c4   :  { %v260_v44 = vadd.f32 %v259_v43, %v180_v41 }
 0x1c5   :  { %v269_v45 = vmax.f32 %v265_v42, 0.0 }
 0x1c6   :  { %v268_v46 = vmax.f32 %v260_v44, 0.0 }
 0x1c8   :  { %v473_v47 = vpack.c.bf16 %v269_v45, %v268_v46 }
 0x1ca   :  { %474 = vmatpush3.bf16.msra.mxu1 %v473_v47 }
 0x1cd   :  { %454 = vmatmul.mubr.msk.f32.vlgmr.msra.gmra.mrb[2].mxu1 %vm277_vm2, %v270_v48 }
 0x2a0   :  { %v347_v50 = vpop.f32.mrb[2].mxu1 }
 0x2a1   :  { %v348_v51 = vadd.f32 %v347_v50, %v275_v49  ;;  %v455_v52 = vpop.f32.mrb[3].mxu1 }
 0x2a3   :  { %v351_v53 = vmax.f32 %v348_v51, 0.0 }
 0x2a5   :  { %v358_v56 = vmul.f32 %v356_v54, %v351_v53 }
 0x2a7   :  { %v359_v57 = vrot.slane %v358_v56, 4 }
 0x2a9   :  { %v360_v59 = vadd.f32 %v359_v57, %v358_v56 }
 0x2ab   :  { %v361_v60 = vrot.slane %v360_v59, 2 }
 0x2ad   :  { %v362_v62 = vadd.f32 %v361_v60, %v360_v59 }
 0x2af   :  { %v363_v0 = vrot.slane %v362_v62, 1 }
 0x2b1   :  { %v364_v2 = vadd.f32 %v363_v0, %v362_v62 }
 0x2b3   :  { %v375_v3 = vadd.f32 %v374_v1, %v364_v2 }
 0x2b5   :  { %376 = vst [vmem:[#allocation3] sm:$0x1] %v375_v3 }
 0x2b6   :  { %493 = shalt.err (!%p490_p4)
}
 0x2b7   :  { %s494_s0 = scalar_lea.hbm %s642_s9, 16 }
 0x2b8   :  { %p495_p5 = scmp.ne.s32.totalorder %s642_s9, %s494_s0  ;;  %p498_p6 = scmp.lt.u32.totalorder %s494_s0, %s642_s9 }
 0x2ba   :  { %p500_p7 = pnand %p498_p6, %p495_p5 }
 0x2bc   :  { %503 = shalt.err (!%p500_p7)
}
 0x2bd   :  { %386 = dma.vmem_to_hbm [thread:$0]  %s384_s5, 16, %s642_s9, [#allocation4]  }
 0x2be   :  { %504 = dma.done.wait [#allocation4], 16  }
 0x2bf   :  { %505 = vsyncadd [#allocation4], 4294967280 }
 0x2c0   :  { %390 = vsyncpa [#allocation4], 1 }

</bundles_post_ra>
